<compile_context>
chip_gen: v6e
topology: v6e:2x2x1
jax: 0.10.0
libtpu: 0.0.40
codegen_flags: <defaults>
</compile_context>

<pallas_src>
import math
import functools

import jax
import jax.numpy as jnp
from jax.experimental import pallas as pl
from jax.experimental.pallas import tpu as pltpu


# ----------------------------------------------------------------------------
# Path 1: VMEM-resident table, one-hot MXU gather, dense (block_n, feat) tiles.
# ----------------------------------------------------------------------------
def _select_resident_kernel(idx_ref, values_ref, out_ref):
    # idx_ref    : VMEM (block_n, 1) int32  -- this chunk's row indices
    # values_ref : VMEM (rows_p, feat)      -- full table, resident across steps
    # out_ref    : VMEM (block_n, feat)
    block_n = out_ref.shape[0]
    rows_p = values_ref.shape[0]
    idx = idx_ref[...]                                            # (block_n, 1)
    iota = jax.lax.broadcasted_iota(jnp.int32, (block_n, rows_p), 1)
    onehot = (iota == idx).astype(values_ref.dtype)               # (block_n, rows_p)
    # Single MXU matmul replaces the per-row scalar gather loop: one dense,
    # unmasked (block_n, feat) store per grid step.
    out_ref[...] = jnp.dot(
        onehot, values_ref[...], preferred_element_type=jnp.float32
    ).astype(out_ref.dtype)


def _select_resident(values_p, idx_col, block_n, vmem_limit_bytes):
    rows_p, feat = values_p.shape
    n_padded = idx_col.shape[0]
    return pl.pallas_call(
        _select_resident_kernel,
        out_shape=jax.ShapeDtypeStruct((n_padded, feat), values_p.dtype),
        grid=(n_padded // block_n,),
        in_specs=[
            pl.BlockSpec((block_n, 1), lambda i: (i, 0)),     # chunk indices
            # Full table as one block; constant block index -> DMA'd once and
            # kept resident in VMEM across all grid steps.
            pl.BlockSpec((rows_p, feat), lambda i: (0, 0)),
        ],
        out_specs=pl.BlockSpec((block_n, feat), lambda i: (i, 0)),
        compiler_params=pltpu.CompilerParams(
            # Disjoint output chunks -> legally parallel (v7x 2-TC sharding).
            dimension_semantics=("parallel",),
            vmem_limit_bytes=vmem_limit_bytes,
        ),
    )(idx_col, values_p)


# ----------------------------------------------------------------------------
# Path 2: big tables -- direct HBM->HBM row DMAs, double-buffered across
# chunks, one aggregated wait per chunk.
# ----------------------------------------------------------------------------
def _select_dma_kernel(idx_ref, values_hbm, out_hbm, sem, *, block_n):
    # idx_ref    : SMEM (n_padded,) int32   (scalar prefetch)
    # values_hbm : HBM  (rows, feat)        (memory_space=pl.ANY)
    # out_hbm    : HBM  (n_padded, feat)    (memory_space=pl.ANY)
    # sem        : DMA semaphores (2,)      one per in-flight chunk
    i = pl.program_id(0)
    n_chunks = pl.num_programs(0)

    def issue(chunk, slot):
        base = chunk * block_n

        @pl.loop(0, block_n)
        def _(j):
            r = idx_ref[base + j]
            # Direct HBM -> HBM row copy: no VMEM bounce, half the data motion.
            pltpu.make_async_copy(
                values_hbm.at[r], out_hbm.at[base + j], sem.at[slot]
            ).start()

    @pl.when(i == 0)
    def _():                       # prime the pipeline with chunk 0
        issue(0, 0)

    @pl.when(i + 1 < n_chunks)
    def _():                       # keep the next chunk's block_n rows in flight
        issue(i + 1, (i + 1) % 2)

    # Aggregated wait: all block_n row copies of chunk i signal sem[i % 2];
    # DMA semaphores count bytes, so a single wait sized (block_n, feat)
    # covers every row of the chunk (no per-row waits, no SMEM-forwarding
    # breakage per row).
    pltpu.make_async_copy(
        out_hbm.at[pl.ds(i * block_n, block_n)],
        out_hbm.at[pl.ds(i * block_n, block_n)],
        sem.at[i % 2],
    ).wait()


def _select_dma(values, indices_padded, block_n):
    rows, feat = values.shape
    n_padded = indices_padded.shape[0]
    return pl.pallas_call(
        functools.partial(_select_dma_kernel, block_n=block_n),
        out_shape=jax.ShapeDtypeStruct((n_padded, feat), values.dtype),
        grid_spec=pltpu.PrefetchScalarGridSpec(
            num_scalar_prefetch=1,
            grid=(n_padded // block_n,),
            in_specs=[pl.BlockSpec(memory_space=pl.ANY)],     # table stays in HBM
            out_specs=pl.BlockSpec(memory_space=pl.ANY),      # gather lands in HBM
            scratch_shapes=[pltpu.SemaphoreType.DMA((2,))],
        ),
        compiler_params=pltpu.CompilerParams(
            # Cross-step DMA pipelining state -> sequential grid.
            dimension_semantics=("arbitrary",),
        ),
    )(indices_padded, values)


# ----------------------------------------------------------------------------
# Dispatcher (forward of the Select module).
# ----------------------------------------------------------------------------
def select_forward(values, indices, *, block_n=256,
                   vmem_table_budget_bytes=None, max_onehot_rows=4096):
    """values: [rows, feat] float; indices: [N] int -> [N, feat]."""
    rows, feat = values.shape
    n = int(indices.shape[0])
    itemsize = jnp.dtype(values.dtype).itemsize

    # Clamp: an out-of-range index would otherwise drive an OOB DMA / empty
    # one-hot (PyTorch raises; we clamp).
    idx = jnp.clip(indices.astype(jnp.int32), 0, rows - 1)

    # Dtype-aware minimum sublane tile (f32: 8, bf16: 16, int8/fp8: 32); shrink
    # block_n for tiny N but keep it a multiple of the minimum.
    min_sub = {4: 8, 2: 16, 1: 32}.get(itemsize, 8)
    bn = int(min(block_n, min_sub * pl.cdiv(n, min_sub)))
    bn = int(min_sub * pl.cdiv(bn, min_sub))
    n_padded = int(bn * pl.cdiv(n, bn))
    if n_padded != n:
        idx = jnp.concatenate([idx, jnp.zeros((n_padded - n,), jnp.int32)])

    # VMEM capacity gate (per-TensorCore; v7x has 64 MiB vs 128 MiB on v5e/v6e).
    if vmem_table_budget_bytes is None:
        try:
            vmem_cap = int(pltpu.get_tpu_info().vmem_capacity_bytes)
        except Exception:
            vmem_cap = 64 * 1024 * 1024            # conservative default (v7x)
        vmem_table_budget_bytes = vmem_cap // 2

    # Resident-path sizes (table rows padded to a multiple of 128 so the
    # one-hot's lane dim / MXU contraction dim is lane-dense on all gens).
    rows_p = int(128 * pl.cdiv(rows, 128))
    table_bytes = rows_p * feat * itemsize
    out_blk_bytes = bn * feat * itemsize
    onehot_bytes = bn * rows_p * 4

    use_resident = (rows_p <= max_onehot_rows
                    and 2 * table_bytes <= vmem_table_budget_bytes)

    if use_resident:
        values_p = (values if rows_p == rows
                    else jnp.pad(values, ((0, rows_p - rows), (0, 0))))
        idx_col = idx.reshape(n_padded, 1)
        # Budget the table twice (default double-buffering of the constant
        # block) plus double-buffered idx/out blocks, the one-hot and headroom.
        vmem_limit = int(max(
            32 * 1024 * 1024,
            2 * table_bytes + 2 * out_blk_bytes + 2 * (bn * 4)
            + onehot_bytes + (4 << 20)))
        out = _select_resident(values_p, idx_col, bn, vmem_limit)
    else:
        out = _select_dma(values, idx, bn)

    return out[:n] if n_padded != n else out


if __name__ == "__main__":
    dim = (16, 128)   # (num_rows, feat_dim) -- the module's `dim`
    n_idx = 12        # number of gathered rows (exercises padding 12 -> 16)

    key = jax.random.PRNGKey(0)
    k_vals, k_idx = jax.random.split(key)

    # Deterministic parameter init matching Select.__init__ semantics.
    bound = 1.0 / math.sqrt(dim[0] * dim[1])
    values = jax.random.normal(k_vals, dim, dtype=jnp.float32) * bound
    indices = jax.random.randint(k_idx, (n_idx,), 0, dim[0], dtype=jnp.int32)

    ref = values[indices, :]

    # Fast path: VMEM-resident table, one-hot MXU gather, dense output tiles.
    out_resident = jax.block_until_ready(select_forward(values, indices))
    assert out_resident.shape == ref.shape and out_resident.dtype == ref.dtype
    assert bool(jnp.allclose(out_resident, ref)), "resident-path mismatch"

    # Big-table path: force the direct HBM->HBM DMA gather.
    out_dma = jax.block_until_ready(
        select_forward(values, indices, vmem_table_budget_bytes=0))
    assert bool(jnp.allclose(out_dma, ref)), "dma-path mismatch"

    print("KERNEL_OK")
</pallas_src>

<mosaic_0001>
module attributes {stable_mosaic.version = 11 : i64} {
  func.func @_select_resident_kernel(%arg0: i32, %arg1: memref<16x1xi32, #tpu.memory_space<vmem>>, %arg2: memref<128x128xf32, #tpu.memory_space<vmem>>, %arg3: memref<16x128xf32, #tpu.memory_space<vmem>>) attributes {dimension_semantics = [#tpu.dimension_semantics<parallel>], iteration_bounds = array<i64: 1>, scalar_prefetch = 0 : i64, scratch_operands = 0 : i64, tpu.core_type = #tpu.core_type<tc>, window_params = [{transform_indices = @transform_0, window_bounds = array<i64: 16, 1>}, {pipeline_mode = #tpu.pipeline_mode<synchronous>, transform_indices = @transform_1, window_bounds = array<i64: 128, 128>}, {transform_indices = @transform_2, window_bounds = array<i64: 16, 128>}]} {
    %c0 = arith.constant 0 : index
    %c0_0 = arith.constant 0 : index
    %0 = vector.load %arg1[%c0, %c0_0] : memref<16x1xi32, #tpu.memory_space<vmem>>, vector<16x1xi32>
    %1 = tpu.iota {dimensions = array<i32: 1>} : vector<16x128xi32>
    %2 = vector.broadcast %0 : vector<16x1xi32> to vector<16x128xi32>
    %3 = arith.cmpi eq, %1, %2 : vector<16x128xi32>
    %4 = arith.extui %3 : vector<16x128xi1> to vector<16x128xi32>
    %5 = arith.sitofp %4 : vector<16x128xi32> to vector<16x128xf32>
    %c0_1 = arith.constant 0 : index
    %c0_2 = arith.constant 0 : index
    %6 = vector.load %arg2[%c0_1, %c0_2] : memref<128x128xf32, #tpu.memory_space<vmem>>, vector<128x128xf32>
    %cst = arith.constant dense<0.000000e+00> : vector<16x128xf32>
    %7 = tpu.matmul %5, %6, %cst {dimension_numbers = #tpu.dot_dimension_numbers<[1], [0], [0], [1], [0, 0, 1, 1], [], []>} : vector<16x128xf32>, vector<128x128xf32>, vector<16x128xf32> -> vector<16x128xf32>
    %c0_3 = arith.constant 0 : index
    %c0_4 = arith.constant 0 : index
    %8 = vector.load %arg3[%c0_3, %c0_4] : memref<16x128xf32, #tpu.memory_space<vmem>>, vector<16x128xf32>
    tpu.vector_store %arg3[%c0_3, %c0_4], %7 {strides = array<i32>} : memref<16x128xf32, #tpu.memory_space<vmem>>, vector<16x128xf32>,
    return
  }
  func.func @transform_0(%arg0: i32) -> (i32, i32) {
    %c0_i32 = arith.constant 0 : i32
    %c0_i32_0 = arith.constant 0 : i32
    return %arg0, %c0_i32 : i32, i32
  }
  func.func @transform_1(%arg0: i32) -> (i32, i32) {
    %c0_i32 = arith.constant 0 : i32
    %c0_i32_0 = arith.constant 0 : i32
    %c0_i32_1 = arith.constant 0 : i32
    return %c0_i32, %c0_i32_0 : i32, i32
  }
  func.func @transform_2(%arg0: i32) -> (i32, i32) {
    %c0_i32 = arith.constant 0 : i32
    %c0_i32_0 = arith.constant 0 : i32
    return %arg0, %c0_i32 : i32, i32
  }
}

</mosaic_0001>

<bundles_post_ra>
// kernel: tpu_custom_call.1
= control target key start
LH: loop header
LB: loop body
LE: loop exit
PB: predicated region body
PF: predicated region fallthrough
CT: control target
= control target key end

     0   :  { %7 = vsyncpa [#allocation3], 0  ;;  %s299_s0 = inlined_call_operand.vmem [shape: s32[16,1], index: 0, kind: input, shape index: {}]   ;;  %s300_s1 = inlined_call_operand.hbm [shape: f32[128,128], index: 1, kind: input, shape index: {}]   ;;  %s301_s2 = inlined_call_operand.hbm [shape: f32[16,128], index: 2, kind: output, shape index: {}]  }
   0x1   :  { %8 = vsyncpa [#allocation4], 0  ;;  %s260_s9 = smov [#allocation2]  }
   0x2   :  { %s16_s10 = sshll.u32 %s260_s9, 4  ;;  %s17_s10 = int_to_ptr.vmem [resolvable:$true] %s16_s10 }
   0x3   :  { %s224_s11 = scalar_lea.vmem %s17_s10, 2048  ;;  %p229_p1 = scmp.lt.s32.totalorder %s17_s10, %s17_s10 }
   0x4   :  { %p225_p0 = scmp.ne.s32.totalorder %s17_s10, %s224_s11  ;;  %p230_p2 = scmp.lt.s32.totalorder %s224_s11, %s224_s11 }
   0x6   :  { %p231_p3 = por %p230_p2, %p229_p1 }
   0x8   :  { %p232_p4 = pnand %p231_p3, %p225_p0 }
   0xa   :  { %235 = shalt.err (!%p232_p4)
}
   0xb   :  { %s261_s12 = smov 128   ;;  %s262_s13 = smov 8  }
   0xc   :  { %22 = dma.hbm_to_vmem [thread:$0]  %s300_s1, 2048, %s17_s10, [#allocation3], %s261_s12, %s261_s12, %s262_s13  }
   0xd   :  { %256 = dma.done.wait [#allocation3], 2048  }
   0xe   :  { %257 = vsyncadd [#allocation3], 4294965248  ;;  %v263_v0 = vmov 0   ;;  %v26_v1 = vld [vmem:[%s299_s0] sm:$0xff]  ;;  %v57_v2 = vld [vmem:[#allocation2 + $0x78] sm:$0xff]  ;;  %v28_v19 = vlaneseq  ;;  %v264_v22 = vmov 1.0  }
   0xf   :  { %215 = vset.pattern.permute.xlu0 %v263_v0  ;;  %174 = vmatprep.subr.mxu0 %v57_v2  ;;  %v56_v3 = vld [vmem:[#allocation2 + $0x70] sm:$0xff]  ;;  %v27_v4 = vld [vmem:[%s299_s0 + $0x8] sm:$0xff]  ;;  %v54_v6 = vld [vmem:[#allocation2 + $0x60] sm:$0xff]  ;;  %s265_s0 = smov [#allocation5]  }
  0x10   :  { %31 = vperm.xlu0 %215, %v26_v1   ;;  %175 = vmatpush3.msra.mxu0 %v57_v2  ;;  %v55_v5 = vld [vmem:[#allocation2 + $0x68] sm:$0xff]  ;;  %v53_v7 = vld [vmem:[#allocation2 + $0x58] sm:$0xff]  ;;  %v52_v8 = vld [vmem:[#allocation2 + $0x50] sm:$0xff]  ;;  %v29_v20 = vand.u32 127, %v28_v19  ;;  %s140_s1 = sshll.u32 %s265_s0, 4  ;;  %s141_s1 = int_to_ptr.vmem [resolvable:$true] %s140_s1 }
  0x11   :  { %176 = vmatprep.subr.mxu0 %v56_v3  ;;  %v51_v9 = vld [vmem:[#allocation2 + $0x48] sm:$0xff]  ;;  %v50_v10 = vld [vmem:[#allocation2 + $0x40] sm:$0xff]  ;;  %v49_v11 = vld [vmem:[#allocation2 + $0x38] sm:$0xff]  ;;  %s236_s20 = scalar_lea.vmem %s141_s1, 256  ;;  %p241_p6 = scmp.lt.s32.totalorder %s141_s1, %s141_s1 }
  0x12   :  { %177 = vmatpush3.msra.mxu0 %v56_v3  ;;  %v48_v12 = vld [vmem:[#allocation2 + $0x30] sm:$0xff]  ;;  %v47_v13 = vld [vmem:[#allocation2 + $0x28] sm:$0xff]  ;;  %v46_v14 = vld [vmem:[#allocation2 + $0x20] sm:$0xff]  ;;  %p237_p5 = scmp.ne.s32.totalorder %s141_s1, %s236_s20  ;;  %p242_p7 = scmp.lt.s32.totalorder %s236_s20, %s236_s20 }
  0x13   :  { %178 = vmatprep.subr.mxu0 %v55_v5  ;;  %v45_v15 = vld [vmem:[#allocation2 + $0x18] sm:$0xff]  ;;  %v44_v16 = vld [vmem:[#allocation2 + $0x10] sm:$0xff]  ;;  %v43_v17 = vld [vmem:[#allocation2 + $0x8] sm:$0xff] }
  0x14   :  { %34 = vperm.xlu0 %215, %v27_v4   ;;  %179 = vmatpush3.msra.mxu0 %v55_v5  ;;  %v42_v18 = vld [vmem:[#allocation2] sm:$0xff]  ;;  %p243_p8 = por %p242_p7, %p241_p6 }
  0x15   :  { %180 = vmatprep.subr.mxu0 %v54_v6 }
  0x16   :  { %181 = vmatpush3.msra.mxu0 %v54_v6  ;;  %p244_p9 = pnand %p243_p8, %p237_p5 }
  0x17   :  { %182 = vmatprep.subr.mxu0 %v53_v7 }
  0x18   :  { %183 = vmatpush3.msra.mxu0 %v53_v7 }
  0x19   :  { %184 = vmatprep.subr.mxu0 %v52_v8 }
  0x1a   :  { %185 = vmatpush3.msra.mxu0 %v52_v8 }
  0x1b   :  { %186 = vmatprep.subr.mxu0 %v51_v9 }
  0x1c   :  { %187 = vmatpush3.msra.mxu0 %v51_v9 }
  0x1d   :  { %188 = vmatprep.subr.mxu0 %v50_v10 }
  0x1e   :  { %189 = vmatpush3.msra.mxu0 %v50_v10 }
  0x1f   :  { %190 = vmatprep.subr.mxu0 %v49_v11 }
  0x20   :  { %191 = vmatpush3.msra.mxu0 %v49_v11 }
  0x21   :  { %192 = vmatprep.subr.mxu0 %v48_v12 }
  0x22   :  { %193 = vmatpush3.msra.mxu0 %v48_v12 }
  0x23   :  { %194 = vmatprep.subr.mxu0 %v47_v13 }
  0x24   :  { %195 = vmatpush3.msra.mxu0 %v47_v13 }
  0x25   :  { %196 = vmatprep.subr.mxu0 %v46_v14 }
  0x26   :  { %197 = vmatpush3.msra.mxu0 %v46_v14 }
  0x27   :  { %198 = vmatprep.subr.mxu0 %v45_v15 }
  0x28   :  { %199 = vmatpush3.msra.mxu0 %v45_v15 }
  0x29   :  { %200 = vmatprep.subr.mxu0 %v44_v16 }
  0x2a   :  { %201 = vmatpush3.msra.mxu0 %v44_v16 }
  0x2b   :  { %202 = vmatprep.subr.mxu0 %v43_v17 }
  0x2c   :  { %203 = vmatpush3.msra.mxu0 %v43_v17 }
  0x2d   :  { %204 = vmatprep.subr.mxu0 %v42_v18 }
  0x2e   :  { %205 = vmatpush3.msra.mxu0 %v42_v18 }
  0x8b   :  { %v32_v21 = vpop.permute.xlu0 %31 }
  0x8c   :  { %vm36_vm0 = vcmp.eq.s32.totalorder %v29_v20, %v32_v21 }
  0x8d   :  { %206 = vmatprep.mubr.msk.f32.mxu0 %vm36_vm0, %v264_v22 }
  0x8f   :  { %v35_v23 = vpop.permute.xlu0 %34 }
  0x90   :  { %vm37_vm1 = vcmp.eq.s32.totalorder %v29_v20, %v35_v23 }
  0x91   :  { %207 = vmatmul.mubr.msk.f32.vlgmr.msra.gmra.mxu0 %vm37_vm1, %v264_v22 }
 0x151   :  { %v208_v24 = vpop.f32.mrf.mxu0 }
 0x152   :  { %134 = vst [vmem:[#allocation5 + $0x8] sm:$0xff] %v208_v24 }
 0x153   :  { %v124_v25 = vpop.f32.mrf.mxu0 }
 0x154   :  { %133 = vst [vmem:[#allocation5] sm:$0xff] %v124_v25 }
 0x155   :  { %247 = shalt.err (!%p244_p9)
}
 0x156   :  { %146 = dma.vmem_to_hbm [thread:$0]  %s141_s1, 256, %s301_s2, [#allocation4], %s261_s12, %s261_s12, %s262_s13  }
 0x157   :  { %258 = dma.done.wait [#allocation4], 256  }
 0x158   :  { %259 = vsyncadd [#allocation4], 4294967040 }
 0x159   :  { %150 = vsyncpa [#allocation3], 1 }
 0x15a   :  { %151 = vsyncpa [#allocation4], 1 }

</bundles_post_ra>
